<compile_context>
chip_gen: v5e
topology: v5e:2x2
jax: 0.10.0
libtpu: 0.0.40
codegen_flags: <defaults>
</compile_context>

<pallas_src>
import functools

import jax
import jax.numpy as jnp
from jax.experimental import pallas as pl
from jax.experimental.pallas import tpu as pltpu

# Tile caps: multiples of 128 (v5e MXU granule) and 256 (v6e/v7x granule).
# Worst-case VMEM use: A (512x512 f32) x3 bufs + B x2 + out x2 + acc ~= 8 MiB,
# far under v7x's 64 MiB even before raising the limit on v5e/v6e.
TILE_M = 512
TILE_N = 512
TILE_K = 512


def _round_up(n, m):
    return ((n + m - 1) // m) * m


def _cdiv(a, b):
    return -(-a // b)


@functools.lru_cache(maxsize=None)
def _vmem_limit_bytes():
    # v5e/v6e have 128 MiB VMEM, v7x has 64 MiB. Use ~3/4 of physical, capped at
    # ~100 MiB (review: raise above the 32 MiB default on v5e/v6e); conservative
    # 64 MiB fallback if the query is unavailable.
    try:
        cap = int(pltpu.get_tpu_info().vmem_capacity_bytes)
        return min(cap * 3 // 4, 100 * 1024 * 1024)
    except Exception:
        return 64 * 1024 * 1024


def _pad2d(x, rows, cols):
    r, c = x.shape
    if r == rows and c == cols:
        return x
    return jnp.pad(x, ((0, rows - r), (0, cols - c)))  # zero pad: inert in matmul


# ---------------------------------------------------------------------------
# Tiled matmul kernel with fused bias + ReLU epilogue.
#   refs = (a_ref, b_ref, [bias_ref], o_ref, acc_ref)
# grid = (M/tm, N/tn, K/tk); K (reduction) is the last, innermost grid axis.
# ---------------------------------------------------------------------------
def _matmul_kernel(*refs, relu, has_bias):
    if has_bias:
        a_ref, b_ref, bias_ref, o_ref, acc_ref = refs
    else:
        a_ref, b_ref, o_ref, acc_ref = refs
        bias_ref = None
    k = pl.program_id(2)

    @pl.when(k == 0)
    def _():
        acc_ref[...] = jnp.zeros_like(acc_ref)

    # f32 operands, f32 accumulation (kernel is HBM-bound on `a`; MXU rate is not
    # the limiter, and this keeps accuracy at the f32 baseline).
    acc_ref[...] += jnp.dot(a_ref[...], b_ref[...],
                            preferred_element_type=jnp.float32)

    @pl.when(k == pl.num_programs(2) - 1)
    def _():
        z = acc_ref[...]
        if has_bias:
            z = z + bias_ref[...]          # broadcasts over rows
        if relu:
            z = jnp.maximum(z, 0.0)
        # Note: padded rows (zero A rows) receive just `bias` here, but they are
        # sliced off in the wrapper and never feed the next layer.
        o_ref[...] = z.astype(o_ref.dtype)


def _pallas_matmul(a, b, bias=None, relu=False):
    """out = relu?( a @ b + bias ), tiled/pipelined on TPU. a:[M,K], b:[K,N]."""
    M, K = a.shape
    K2, N = b.shape
    assert K == K2, (a.shape, b.shape)
    has_bias = bias is not None

    # Single-tile dims use block == full dim (no pad, no copy). Multi-tile dims use
    # the cap and the array is zero-padded to a tile multiple only when ragged.
    tm = M if M <= TILE_M else TILE_M
    tk = K if K <= TILE_K else TILE_K
    tn = N if N <= TILE_N else TILE_N
    Mp, Kp, Np = _round_up(M, tm), _round_up(K, tk), _round_up(N, tn)

    a_p = _pad2d(a, Mp, Kp)
    b_p = _pad2d(b, Kp, Np)

    grid = (Mp // tm, Np // tn, Kp // tk)
    nk = grid[2]

    # Deepen buffering on the streamed A operand when the reduction is long enough
    # to benefit (it is the HBM-roofline term of the aggregation matmul).
    if nk >= 3:
        a_spec = pl.BlockSpec((tm, tk), lambda i, j, k: (i, k),
                              pipeline_mode=pl.Buffered(3))
    else:
        a_spec = pl.BlockSpec((tm, tk), lambda i, j, k: (i, k))
    b_spec = pl.BlockSpec((tk, tn), lambda i, j, k: (k, j))
    out_spec = pl.BlockSpec((tm, tn), lambda i, j, k: (i, j))

    in_specs = [a_spec, b_spec]
    operands = [a_p, b_p]
    if has_bias:
        bias_p = _pad2d(bias.reshape(1, -1), 1, Np)
        in_specs.append(pl.BlockSpec((1, tn), lambda i, j, k: (0, j)))
        operands.append(bias_p)

    out = pl.pallas_call(
        functools.partial(_matmul_kernel, relu=relu, has_bias=has_bias),
        out_shape=jax.ShapeDtypeStruct((Mp, Np), jnp.float32),
        grid_spec=pltpu.PrefetchScalarGridSpec(
            num_scalar_prefetch=0,
            grid=grid,
            in_specs=in_specs,
            out_specs=out_spec,
            scratch_shapes=[pltpu.VMEM((tm, tn), jnp.float32)],
        ),
        compiler_params=pltpu.CompilerParams(
            dimension_semantics=("parallel", "parallel", "arbitrary"),
            vmem_limit_bytes=_vmem_limit_bytes(),
        ),
    )(*operands)

    if Mp != M or Np != N:
        out = out[:M, :N]
    return out


# ---------------------------------------------------------------------------
# Static per-layer schedule.
# ---------------------------------------------------------------------------
def _mxu_passes(m, k, n, sub=8, lane=128):
    # MXU passes at 8-row x 128-lane x 128-contraction granularity (exact for v5e;
    # monotone-consistent comparison for the 256-wide v6e/v7x MXUs).
    return _cdiv(m, sub) * _cdiv(k, lane) * _cdiv(n, lane)


def _agg_first(a_shape, w_shape):
    n_dst, n_src = a_shape
    din, dout = w_shape
    cost_agg = _mxu_passes(n_dst, n_src, din) + _mxu_passes(n_dst, din, dout)   # (A@H)@W
    cost_xw = _mxu_passes(n_src, din, dout) + _mxu_passes(n_dst, n_src, dout)   # A@(H@W)
    return cost_agg <= cost_xw


def _relu_schedule(n_layers):
    # internal: GraphConv(activation=...) for layers 1..L-1 (incl. last, per the spec).
    # wrapper : DistGCN.forward applies activation (+ eval-identity dropout) for l != last.
    flags = []
    for l in range(n_layers):
        internal = l >= 1
        wrapper = l != n_layers - 1
        flags.append(bool(internal or wrapper))
    return tuple(flags)


# ---------------------------------------------------------------------------
# DistGCN forward.
# ---------------------------------------------------------------------------
def dist_gcn_forward(blocks, x, params):
    """
    blocks : list of dense normalized adjacencies A_hat[l], shape [n_dst_l, n_src_l],
             with n_src_{l+1} == n_dst_l.
    x      : [n_src_0, in_feats] input node features (f32).
    params : list of (W, b) per layer (f32).
    """
    n_layers = len(params)
    relu_flags = _relu_schedule(n_layers)

    h = x
    for l, (a, (w, b)) in enumerate(zip(blocks, params)):
        relu = relu_flags[l]
        if _agg_first(a.shape, w.shape):
            ah = _pallas_matmul(a, h)                      # aggregate
            h = _pallas_matmul(ah, w, bias=b, relu=relu)   # transform + bias + relu
        else:
            hw = _pallas_matmul(h, w)                      # transform
            h = _pallas_matmul(a, hw, bias=b, relu=relu)   # aggregate + bias + relu
    return h


# Pure-JAX f32 reference (precision=HIGHEST) for a sanity check.
def dist_gcn_reference(blocks, x, params):
    relu_flags = _relu_schedule(len(params))
    hi = jax.lax.Precision.HIGHEST
    h = x
    for l, (a, (w, b)) in enumerate(zip(blocks, params)):
        z = jnp.dot(jnp.dot(a, h, precision=hi), w, precision=hi) + b[None, :]
        if relu_flags[l]:
            z = jnp.maximum(z, 0.0)
        h = z
    return h


# ---------------------------------------------------------------------------
# Deterministic synthetic setup
# ---------------------------------------------------------------------------
def make_block_adjacency(key, n_dst, n_src, p=0.3):
    """Random bipartite block graph, normalized as in DGL GraphConv (norm='both')."""
    a = (jax.random.uniform(key, (n_dst, n_src)) < p).astype(jnp.float32)
    deg_src = jnp.maximum(a.sum(axis=0), 1.0)
    deg_dst = jnp.maximum(a.sum(axis=1), 1.0)
    return a / jnp.sqrt(deg_dst)[:, None] / jnp.sqrt(deg_src)[None, :]


def init_params(key, in_feats, n_hidden, n_classes, n_layers):
    dims = [in_feats] + [n_hidden] * (n_layers - 1) + [n_classes]
    params = []
    for l in range(n_layers):
        key, kw = jax.random.split(key)
        fan_in, fan_out = dims[l], dims[l + 1]
        w = jax.random.normal(kw, (fan_in, fan_out), jnp.float32) * (1.0 / jnp.sqrt(fan_in))
        b = jnp.zeros((fan_out,), jnp.float32)
        params.append((w, b))
    return params


if __name__ == "__main__":
    key = jax.random.PRNGKey(0)

    def run_case(name, node_counts, in_feats, n_hidden, n_classes, key):
        n_layers = len(node_counts) - 1
        key, kx = jax.random.split(key)
        x = jax.random.normal(kx, (node_counts[0], in_feats), jnp.float32)
        blocks = []
        for l in range(n_layers):
            key, kb = jax.random.split(key)
            blocks.append(make_block_adjacency(kb, node_counts[l + 1], node_counts[l]))
        key, kp = jax.random.split(key)
        params = init_params(kp, in_feats, n_hidden, n_classes, n_layers)

        out = jax.jit(dist_gcn_forward)(blocks, x, params)
        out = jax.block_until_ready(out)
        assert out.shape == (node_counts[-1], n_classes), (name, out.shape)
        assert bool(jnp.all(jnp.isfinite(out))), name

        ref = dist_gcn_reference(blocks, x, params)
        err = float(jnp.max(jnp.abs(out - ref)))
        assert bool(jnp.allclose(out, ref, atol=5e-2, rtol=5e-2)), (name, err)
        return key

    # Small case (original example shapes): single-tile grids, no padding copies.
    key = run_case("small", [64, 48, 32, 16], 16, 32, 8, key)
    # Larger, ragged case: exercises multi-tile grids, the K-accumulator,
    # Buffered(3) on the A stream, and ragged-edge zero padding.
    key = run_case("large", [2000, 512, 160, 96], 200, 128, 40, key)

    print("KERNEL_OK")
</pallas_src>

<mosaic_0001>
module attributes {stable_mosaic.version = 11 : i64} {
  func.func @_matmul_kernel(%arg0: i32, %arg1: i32, %arg2: i32, %arg3: memref<48x64xf32, #tpu.memory_space<vmem>>, %arg4: memref<64x16xf32, #tpu.memory_space<vmem>>, %arg5: memref<48x16xf32, #tpu.memory_space<vmem>>, %arg6: memref<48x16xf32, #tpu.memory_space<vmem>>) attributes {dimension_semantics = [#tpu.dimension_semantics<parallel>, #tpu.dimension_semantics<parallel>, #tpu.dimension_semantics<arbitrary>], iteration_bounds = array<i64: 1, 1, 1>, scalar_prefetch = 0 : i64, scratch_operands = 1 : i64, tpu.core_type = #tpu.core_type<tc>, window_params = [{transform_indices = @transform_0, window_bounds = array<i64: 48, 64>}, {transform_indices = @transform_1, window_bounds = array<i64: 64, 16>}, {transform_indices = @transform_2, window_bounds = array<i64: 48, 16>}]} {
    %c0_i32 = arith.constant 0 : i32
    %0 = arith.cmpi eq, %arg2, %c0_i32 : i32
    %1 = arith.extui %0 : i1 to i32
    %c0_i32_0 = arith.constant 0 : i32
    %2 = arith.cmpi ne, %1, %c0_i32_0 : i32
    scf.if %2 {
      %cst_10 = arith.constant 0.000000e+00 : f32
      %12 = vector.broadcast %cst_10 : f32 to vector<48x16xf32>
      %c0_11 = arith.constant 0 : index
      %c0_12 = arith.constant 0 : index
      %13 = vector.load %arg6[%c0_11, %c0_12] : memref<48x16xf32, #tpu.memory_space<vmem>>, vector<48x16xf32>
      tpu.vector_store %arg6[%c0_11, %c0_12], %12 {strides = array<i32>} : memref<48x16xf32, #tpu.memory_space<vmem>>, vector<48x16xf32>,
    } else {
    }
    %c0 = arith.constant 0 : index
    %c0_1 = arith.constant 0 : index
    %3 = vector.load %arg6[%c0, %c0_1] : memref<48x16xf32, #tpu.memory_space<vmem>>, vector<48x16xf32>
    %c0_2 = arith.constant 0 : index
    %c0_3 = arith.constant 0 : index
    %4 = vector.load %arg3[%c0_2, %c0_3] : memref<48x64xf32, #tpu.memory_space<vmem>>, vector<48x64xf32>
    %c0_4 = arith.constant 0 : index
    %c0_5 = arith.constant 0 : index
    %5 = vector.load %arg4[%c0_4, %c0_5] : memref<64x16xf32, #tpu.memory_space<vmem>>, vector<64x16xf32>
    %cst = arith.constant dense<0.000000e+00> : vector<48x16xf32>
    %6 = tpu.matmul %4, %5, %cst {dimension_numbers = #tpu.dot_dimension_numbers<[1], [0], [0], [1], [0, 0, 1, 1], [], []>} : vector<48x64xf32>, vector<64x16xf32>, vector<48x16xf32> -> vector<48x16xf32>
    %7 = arith.addf %3, %6 : vector<48x16xf32>
    %c0_6 = arith.constant 0 : index
    %c0_7 = arith.constant 0 : index
    %8 = vector.load %arg6[%c0_6, %c0_7] : memref<48x16xf32, #tpu.memory_space<vmem>>, vector<48x16xf32>
    tpu.vector_store %arg6[%c0_6, %c0_7], %7 {strides = array<i32>} : memref<48x16xf32, #tpu.memory_space<vmem>>, vector<48x16xf32>,
    %c0_i32_8 = arith.constant 0 : i32
    %9 = arith.cmpi eq, %arg2, %c0_i32_8 : i32
    %10 = arith.extui %9 : i1 to i32
    %c0_i32_9 = arith.constant 0 : i32
    %11 = arith.cmpi ne, %10, %c0_i32_9 : i32
    scf.if %11 {
      %c0_10 = arith.constant 0 : index
      %c0_11 = arith.constant 0 : index
      %12 = vector.load %arg6[%c0_10, %c0_11] : memref<48x16xf32, #tpu.memory_space<vmem>>, vector<48x16xf32>
      %c0_12 = arith.constant 0 : index
      %c0_13 = arith.constant 0 : index
      %13 = vector.load %arg5[%c0_12, %c0_13] : memref<48x16xf32, #tpu.memory_space<vmem>>, vector<48x16xf32>
      tpu.vector_store %arg5[%c0_12, %c0_13], %12 {strides = array<i32>} : memref<48x16xf32, #tpu.memory_space<vmem>>, vector<48x16xf32>,
    } else {
    }
    return
  }
  func.func @transform_0(%arg0: i32, %arg1: i32, %arg2: i32) -> (i32, i32) {
    %c0_i32 = arith.constant 0 : i32
    return %arg0, %arg2 : i32, i32
  }
  func.func @transform_1(%arg0: i32, %arg1: i32, %arg2: i32) -> (i32, i32) {
    %c0_i32 = arith.constant 0 : i32
    return %arg2, %arg1 : i32, i32
  }
  func.func @transform_2(%arg0: i32, %arg1: i32, %arg2: i32) -> (i32, i32) {
    %c0_i32 = arith.constant 0 : i32
    return %arg0, %arg1 : i32, i32
  }
}

module attributes {stable_mosaic.version = 11 : i64} {
  func.func @_matmul_kernel(%arg0: i32, %arg1: i32, %arg2: i32, %arg3: memref<32x32xf32, #tpu.memory_space<vmem>>, %arg4: memref<32x32xf32, #tpu.memory_space<vmem>>, %arg5: memref<1x32xf32, #tpu.memory_space<vmem>>, %arg6: memref<32x32xf32, #tpu.memory_space<vmem>>, %arg7: memref<32x32xf32, #tpu.memory_space<vmem>>) attributes {dimension_semantics = [#tpu.dimension_semantics<parallel>, #tpu.dimension_semantics<parallel>, #tpu.dimension_semantics<arbitrary>], iteration_bounds = array<i64: 1, 1, 1>, scalar_prefetch = 0 : i64, scratch_operands = 1 : i64, tpu.core_type = #tpu.core_type<tc>, window_params = [{transform_indices = @transform_0, window_bounds = array<i64: 32, 32>}, {transform_indices = @transform_1, window_bounds = array<i64: 32, 32>}, {transform_indices = @transform_2, window_bounds = array<i64: 1, 32>}, {transform_indices = @transform_3, window_bounds = array<i64: 32, 32>}]} {
    %c0_i32 = arith.constant 0 : i32
    %0 = arith.cmpi eq, %arg2, %c0_i32 : i32
    %1 = arith.extui %0 : i1 to i32
    %c0_i32_0 = arith.constant 0 : i32
    %2 = arith.cmpi ne, %1, %c0_i32_0 : i32
    scf.if %2 {
      %cst_10 = arith.constant 0.000000e+00 : f32
      %12 = vector.broadcast %cst_10 : f32 to vector<32x32xf32>
      %c0_11 = arith.constant 0 : index
      %c0_12 = arith.constant 0 : index
      %13 = vector.load %arg7[%c0_11, %c0_12] : memref<32x32xf32, #tpu.memory_space<vmem>>, vector<32x32xf32>
      tpu.vector_store %arg7[%c0_11, %c0_12], %12 {strides = array<i32>} : memref<32x32xf32, #tpu.memory_space<vmem>>, vector<32x32xf32>,
    } else {
    }
    %c0 = arith.constant 0 : index
    %c0_1 = arith.constant 0 : index
    %3 = vector.load %arg7[%c0, %c0_1] : memref<32x32xf32, #tpu.memory_space<vmem>>, vector<32x32xf32>
    %c0_2 = arith.constant 0 : index
    %c0_3 = arith.constant 0 : index
    %4 = vector.load %arg3[%c0_2, %c0_3] : memref<32x32xf32, #tpu.memory_space<vmem>>, vector<32x32xf32>
    %c0_4 = arith.constant 0 : index
    %c0_5 = arith.constant 0 : index
    %5 = vector.load %arg4[%c0_4, %c0_5] : memref<32x32xf32, #tpu.memory_space<vmem>>, vector<32x32xf32>
    %cst = arith.constant dense<0.000000e+00> : vector<32x32xf32>
    %6 = tpu.matmul %4, %5, %cst {dimension_numbers = #tpu.dot_dimension_numbers<[1], [0], [0], [1], [0, 0, 1, 1], [], []>} : vector<32x32xf32>, vector<32x32xf32>, vector<32x32xf32> -> vector<32x32xf32>
    %7 = arith.addf %3, %6 : vector<32x32xf32>
    %c0_6 = arith.constant 0 : index
    %c0_7 = arith.constant 0 : index
    %8 = vector.load %arg7[%c0_6, %c0_7] : memref<32x32xf32, #tpu.memory_space<vmem>>, vector<32x32xf32>
    tpu.vector_store %arg7[%c0_6, %c0_7], %7 {strides = array<i32>} : memref<32x32xf32, #tpu.memory_space<vmem>>, vector<32x32xf32>,
    %c0_i32_8 = arith.constant 0 : i32
    %9 = arith.cmpi eq, %arg2, %c0_i32_8 : i32
    %10 = arith.extui %9 : i1 to i32
    %c0_i32_9 = arith.constant 0 : i32
    %11 = arith.cmpi ne, %10, %c0_i32_9 : i32
    scf.if %11 {
      %c0_10 = arith.constant 0 : index
      %c0_11 = arith.constant 0 : index
      %12 = vector.load %arg7[%c0_10, %c0_11] : memref<32x32xf32, #tpu.memory_space<vmem>>, vector<32x32xf32>
      %c0_12 = arith.constant 0 : index
      %c0_13 = arith.constant 0 : index
      %13 = vector.load %arg5[%c0_12, %c0_13] : memref<1x32xf32, #tpu.memory_space<vmem>>, vector<1x32xf32>
      %14 = vector.broadcast %13 : vector<1x32xf32> to vector<32x32xf32>
      %15 = arith.addf %12, %14 : vector<32x32xf32>
      %cst_14 = arith.constant 0.000000e+00 : f32
      %16 = vector.broadcast %cst_14 : f32 to vector<32x32xf32>
      %17 = arith.maximumf %15, %16 : vector<32x32xf32>
      %c0_15 = arith.constant 0 : index
      %c0_16 = arith.constant 0 : index
      %18 = vector.load %arg6[%c0_15, %c0_16] : memref<32x32xf32, #tpu.memory_space<vmem>>, vector<32x32xf32>
      tpu.vector_store %arg6[%c0_15, %c0_16], %17 {strides = array<i32>} : memref<32x32xf32, #tpu.memory_space<vmem>>, vector<32x32xf32>,
    } else {
    }
    return
  }
  func.func @transform_0(%arg0: i32, %arg1: i32, %arg2: i32) -> (i32, i32) {
    %c0_i32 = arith.constant 0 : i32
    return %arg0, %arg2 : i32, i32
  }
  func.func @transform_1(%arg0: i32, %arg1: i32, %arg2: i32) -> (i32, i32) {
    %c0_i32 = arith.constant 0 : i32
    return %arg2, %arg1 : i32, i32
  }
  func.func @transform_2(%arg0: i32, %arg1: i32, %arg2: i32) -> (i32, i32) {
    %c0_i32 = arith.constant 0 : i32
    %c0_i32_0 = arith.constant 0 : i32
    return %c0_i32, %arg1 : i32, i32
  }
  func.func @transform_3(%arg0: i32, %arg1: i32, %arg2: i32) -> (i32, i32) {
    %c0_i32 = arith.constant 0 : i32
    return %arg0, %arg1 : i32, i32
  }
}

module attributes {stable_mosaic.version = 11 : i64} {
  func.func @_matmul_kernel(%arg0: i32, %arg1: i32, %arg2: i32, %arg3: memref<48x16xf32, #tpu.memory_space<vmem>>, %arg4: memref<16x32xf32, #tpu.memory_space<vmem>>, %arg5: memref<1x32xf32, #tpu.memory_space<vmem>>, %arg6: memref<48x32xf32, #tpu.memory_space<vmem>>, %arg7: memref<48x32xf32, #tpu.memory_space<vmem>>) attributes {dimension_semantics = [#tpu.dimension_semantics<parallel>, #tpu.dimension_semantics<parallel>, #tpu.dimension_semantics<arbitrary>], iteration_bounds = array<i64: 1, 1, 1>, scalar_prefetch = 0 : i64, scratch_operands = 1 : i64, tpu.core_type = #tpu.core_type<tc>, window_params = [{transform_indices = @transform_0, window_bounds = array<i64: 48, 16>}, {transform_indices = @transform_1, window_bounds = array<i64: 16, 32>}, {transform_indices = @transform_2, window_bounds = array<i64: 1, 32>}, {transform_indices = @transform_3, window_bounds = array<i64: 48, 32>}]} {
    %c0_i32 = arith.constant 0 : i32
    %0 = arith.cmpi eq, %arg2, %c0_i32 : i32
    %1 = arith.extui %0 : i1 to i32
    %c0_i32_0 = arith.constant 0 : i32
    %2 = arith.cmpi ne, %1, %c0_i32_0 : i32
    scf.if %2 {
      %cst_10 = arith.constant 0.000000e+00 : f32
      %12 = vector.broadcast %cst_10 : f32 to vector<48x32xf32>
      %c0_11 = arith.constant 0 : index
      %c0_12 = arith.constant 0 : index
      %13 = vector.load %arg7[%c0_11, %c0_12] : memref<48x32xf32, #tpu.memory_space<vmem>>, vector<48x32xf32>
      tpu.vector_store %arg7[%c0_11, %c0_12], %12 {strides = array<i32>} : memref<48x32xf32, #tpu.memory_space<vmem>>, vector<48x32xf32>,
    } else {
    }
    %c0 = arith.constant 0 : index
    %c0_1 = arith.constant 0 : index
    %3 = vector.load %arg7[%c0, %c0_1] : memref<48x32xf32, #tpu.memory_space<vmem>>, vector<48x32xf32>
    %c0_2 = arith.constant 0 : index
    %c0_3 = arith.constant 0 : index
    %4 = vector.load %arg3[%c0_2, %c0_3] : memref<48x16xf32, #tpu.memory_space<vmem>>, vector<48x16xf32>
    %c0_4 = arith.constant 0 : index
    %c0_5 = arith.constant 0 : index
    %5 = vector.load %arg4[%c0_4, %c0_5] : memref<16x32xf32, #tpu.memory_space<vmem>>, vector<16x32xf32>
    %cst = arith.constant dense<0.000000e+00> : vector<48x32xf32>
    %6 = tpu.matmul %4, %5, %cst {dimension_numbers = #tpu.dot_dimension_numbers<[1], [0], [0], [1], [0, 0, 1, 1], [], []>} : vector<48x16xf32>, vector<16x32xf32>, vector<48x32xf32> -> vector<48x32xf32>
    %7 = arith.addf %3, %6 : vector<48x32xf32>
    %c0_6 = arith.constant 0 : index
    %c0_7 = arith.constant 0 : index
    %8 = vector.load %arg7[%c0_6, %c0_7] : memref<48x32xf32, #tpu.memory_space<vmem>>, vector<48x32xf32>
    tpu.vector_store %arg7[%c0_6, %c0_7], %7 {strides = array<i32>} : memref<48x32xf32, #tpu.memory_space<vmem>>, vector<48x32xf32>,
    %c0_i32_8 = arith.constant 0 : i32
    %9 = arith.cmpi eq, %arg2, %c0_i32_8 : i32
    %10 = arith.extui %9 : i1 to i32
    %c0_i32_9 = arith.constant 0 : i32
    %11 = arith.cmpi ne, %10, %c0_i32_9 : i32
    scf.if %11 {
      %c0_10 = arith.constant 0 : index
      %c0_11 = arith.constant 0 : index
      %12 = vector.load %arg7[%c0_10, %c0_11] : memref<48x32xf32, #tpu.memory_space<vmem>>, vector<48x32xf32>
      %c0_12 = arith.constant 0 : index
      %c0_13 = arith.constant 0 : index
      %13 = vector.load %arg5[%c0_12, %c0_13] : memref<1x32xf32, #tpu.memory_space<vmem>>, vector<1x32xf32>
      %14 = vector.broadcast %13 : vector<1x32xf32> to vector<48x32xf32>
      %15 = arith.addf %12, %14 : vector<48x32xf32>
      %cst_14 = arith.constant 0.000000e+00 : f32
      %16 = vector.broadcast %cst_14 : f32 to vector<48x32xf32>
      %17 = arith.maximumf %15, %16 : vector<48x32xf32>
      %c0_15 = arith.constant 0 : index
      %c0_16 = arith.constant 0 : index
      %18 = vector.load %arg6[%c0_15, %c0_16] : memref<48x32xf32, #tpu.memory_space<vmem>>, vector<48x32xf32>
      tpu.vector_store %arg6[%c0_15, %c0_16], %17 {strides = array<i32>} : memref<48x32xf32, #tpu.memory_space<vmem>>, vector<48x32xf32>,
    } else {
    }
    return
  }
  func.func @transform_0(%arg0: i32, %arg1: i32, %arg2: i32) -> (i32, i32) {
    %c0_i32 = arith.constant 0 : i32
    return %arg0, %arg2 : i32, i32
  }
  func.func @transform_1(%arg0: i32, %arg1: i32, %arg2: i32) -> (i32, i32) {
    %c0_i32 = arith.constant 0 : i32
    return %arg2, %arg1 : i32, i32
  }
  func.func @transform_2(%arg0: i32, %arg1: i32, %arg2: i32) -> (i32, i32) {
    %c0_i32 = arith.constant 0 : i32
    %c0_i32_0 = arith.constant 0 : i32
    return %c0_i32, %arg1 : i32, i32
  }
  func.func @transform_3(%arg0: i32, %arg1: i32, %arg2: i32) -> (i32, i32) {
    %c0_i32 = arith.constant 0 : i32
    return %arg0, %arg1 : i32, i32
  }
}

module attributes {stable_mosaic.version = 11 : i64} {
  func.func @_matmul_kernel(%arg0: i32, %arg1: i32, %arg2: i32, %arg3: memref<32x48xf32, #tpu.memory_space<vmem>>, %arg4: memref<48x32xf32, #tpu.memory_space<vmem>>, %arg5: memref<32x32xf32, #tpu.memory_space<vmem>>, %arg6: memref<32x32xf32, #tpu.memory_space<vmem>>) attributes {dimension_semantics = [#tpu.dimension_semantics<parallel>, #tpu.dimension_semantics<parallel>, #tpu.dimension_semantics<arbitrary>], iteration_bounds = array<i64: 1, 1, 1>, scalar_prefetch = 0 : i64, scratch_operands = 1 : i64, tpu.core_type = #tpu.core_type<tc>, window_params = [{transform_indices = @transform_0, window_bounds = array<i64: 32, 48>}, {transform_indices = @transform_1, window_bounds = array<i64: 48, 32>}, {transform_indices = @transform_2, window_bounds = array<i64: 32, 32>}]} {
    %c0_i32 = arith.constant 0 : i32
    %0 = arith.cmpi eq, %arg2, %c0_i32 : i32
    %1 = arith.extui %0 : i1 to i32
    %c0_i32_0 = arith.constant 0 : i32
    %2 = arith.cmpi ne, %1, %c0_i32_0 : i32
    scf.if %2 {
      %cst_10 = arith.constant 0.000000e+00 : f32
      %12 = vector.broadcast %cst_10 : f32 to vector<32x32xf32>
      %c0_11 = arith.constant 0 : index
      %c0_12 = arith.constant 0 : index
      %13 = vector.load %arg6[%c0_11, %c0_12] : memref<32x32xf32, #tpu.memory_space<vmem>>, vector<32x32xf32>
      tpu.vector_store %arg6[%c0_11, %c0_12], %12 {strides = array<i32>} : memref<32x32xf32, #tpu.memory_space<vmem>>, vector<32x32xf32>,
    } else {
    }
    %c0 = arith.constant 0 : index
    %c0_1 = arith.constant 0 : index
    %3 = vector.load %arg6[%c0, %c0_1] : memref<32x32xf32, #tpu.memory_space<vmem>>, vector<32x32xf32>
    %c0_2 = arith.constant 0 : index
    %c0_3 = arith.constant 0 : index
    %4 = vector.load %arg3[%c0_2, %c0_3] : memref<32x48xf32, #tpu.memory_space<vmem>>, vector<32x48xf32>
    %c0_4 = arith.constant 0 : index
    %c0_5 = arith.constant 0 : index
    %5 = vector.load %arg4[%c0_4, %c0_5] : memref<48x32xf32, #tpu.memory_space<vmem>>, vector<48x32xf32>
    %cst = arith.constant dense<0.000000e+00> : vector<32x32xf32>
    %6 = tpu.matmul %4, %5, %cst {dimension_numbers = #tpu.dot_dimension_numbers<[1], [0], [0], [1], [0, 0, 1, 1], [], []>} : vector<32x48xf32>, vector<48x32xf32>, vector<32x32xf32> -> vector<32x32xf32>
    %7 = arith.addf %3, %6 : vector<32x32xf32>
    %c0_6 = arith.constant 0 : index
    %c0_7 = arith.constant 0 : index
    %8 = vector.load %arg6[%c0_6, %c0_7] : memref<32x32xf32, #tpu.memory_space<vmem>>, vector<32x32xf32>
    tpu.vector_store %arg6[%c0_6, %c0_7], %7 {strides = array<i32>} : memref<32x32xf32, #tpu.memory_space<vmem>>, vector<32x32xf32>,
    %c0_i32_8 = arith.constant 0 : i32
    %9 = arith.cmpi eq, %arg2, %c0_i32_8 : i32
    %10 = arith.extui %9 : i1 to i32
    %c0_i32_9 = arith.constant 0 : i32
    %11 = arith.cmpi ne, %10, %c0_i32_9 : i32
    scf.if %11 {
      %c0_10 = arith.constant 0 : index
      %c0_11 = arith.constant 0 : index
      %12 = vector.load %arg6[%c0_10, %c0_11] : memref<32x32xf32, #tpu.memory_space<vmem>>, vector<32x32xf32>
      %c0_12 = arith.constant 0 : index
      %c0_13 = arith.constant 0 : index
      %13 = vector.load %arg5[%c0_12, %c0_13] : memref<32x32xf32, #tpu.memory_space<vmem>>, vector<32x32xf32>
      tpu.vector_store %arg5[%c0_12, %c0_13], %12 {strides = array<i32>} : memref<32x32xf32, #tpu.memory_space<vmem>>, vector<32x32xf32>,
    } else {
    }
    return
  }
  func.func @transform_0(%arg0: i32, %arg1: i32, %arg2: i32) -> (i32, i32) {
    %c0_i32 = arith.constant 0 : i32
    return %arg0, %arg2 : i32, i32
  }
  func.func @transform_1(%arg0: i32, %arg1: i32, %arg2: i32) -> (i32, i32) {
    %c0_i32 = arith.constant 0 : i32
    return %arg2, %arg1 : i32, i32
  }
  func.func @transform_2(%arg0: i32, %arg1: i32, %arg2: i32) -> (i32, i32) {
    %c0_i32 = arith.constant 0 : i32
    return %arg0, %arg1 : i32, i32
  }
}

module attributes {stable_mosaic.version = 11 : i64} {
  func.func @_matmul_kernel(%arg0: i32, %arg1: i32, %arg2: i32, %arg3: memref<16x32xf32, #tpu.memory_space<vmem>>, %arg4: memref<32x8xf32, #tpu.memory_space<vmem>>, %arg5: memref<1x8xf32, #tpu.memory_space<vmem>>, %arg6: memref<16x8xf32, #tpu.memory_space<vmem>>, %arg7: memref<16x8xf32, #tpu.memory_space<vmem>>) attributes {dimension_semantics = [#tpu.dimension_semantics<parallel>, #tpu.dimension_semantics<parallel>, #tpu.dimension_semantics<arbitrary>], iteration_bounds = array<i64: 1, 1, 1>, scalar_prefetch = 0 : i64, scratch_operands = 1 : i64, tpu.core_type = #tpu.core_type<tc>, window_params = [{transform_indices = @transform_0, window_bounds = array<i64: 16, 32>}, {transform_indices = @transform_1, window_bounds = array<i64: 32, 8>}, {transform_indices = @transform_2, window_bounds = array<i64: 1, 8>}, {transform_indices = @transform_3, window_bounds = array<i64: 16, 8>}]} {
    %c0_i32 = arith.constant 0 : i32
    %0 = arith.cmpi eq, %arg2, %c0_i32 : i32
    %1 = arith.extui %0 : i1 to i32
    %c0_i32_0 = arith.constant 0 : i32
    %2 = arith.cmpi ne, %1, %c0_i32_0 : i32
    scf.if %2 {
      %cst_10 = arith.constant 0.000000e+00 : f32
      %12 = vector.broadcast %cst_10 : f32 to vector<16x8xf32>
      %c0_11 = arith.constant 0 : index
      %c0_12 = arith.constant 0 : index
      %13 = vector.load %arg7[%c0_11, %c0_12] : memref<16x8xf32, #tpu.memory_space<vmem>>, vector<16x8xf32>
      tpu.vector_store %arg7[%c0_11, %c0_12], %12 {strides = array<i32>} : memref<16x8xf32, #tpu.memory_space<vmem>>, vector<16x8xf32>,
    } else {
    }
    %c0 = arith.constant 0 : index
    %c0_1 = arith.constant 0 : index
    %3 = vector.load %arg7[%c0, %c0_1] : memref<16x8xf32, #tpu.memory_space<vmem>>, vector<16x8xf32>
    %c0_2 = arith.constant 0 : index
    %c0_3 = arith.constant 0 : index
    %4 = vector.load %arg3[%c0_2, %c0_3] : memref<16x32xf32, #tpu.memory_space<vmem>>, vector<16x32xf32>
    %c0_4 = arith.constant 0 : index
    %c0_5 = arith.constant 0 : index
    %5 = vector.load %arg4[%c0_4, %c0_5] : memref<32x8xf32, #tpu.memory_space<vmem>>, vector<32x8xf32>
    %cst = arith.constant dense<0.000000e+00> : vector<16x8xf32>
    %6 = tpu.matmul %4, %5, %cst {dimension_numbers = #tpu.dot_dimension_numbers<[1], [0], [0], [1], [0, 0, 1, 1], [], []>} : vector<16x32xf32>, vector<32x8xf32>, vector<16x8xf32> -> vector<16x8xf32>
    %7 = arith.addf %3, %6 : vector<16x8xf32>
    %c0_6 = arith.constant 0 : index
    %c0_7 = arith.constant 0 : index
    %8 = vector.load %arg7[%c0_6, %c0_7] : memref<16x8xf32, #tpu.memory_space<vmem>>, vector<16x8xf32>
    tpu.vector_store %arg7[%c0_6, %c0_7], %7 {strides = array<i32>} : memref<16x8xf32, #tpu.memory_space<vmem>>, vector<16x8xf32>,
    %c0_i32_8 = arith.constant 0 : i32
    %9 = arith.cmpi eq, %arg2, %c0_i32_8 : i32
    %10 = arith.extui %9 : i1 to i32
    %c0_i32_9 = arith.constant 0 : i32
    %11 = arith.cmpi ne, %10, %c0_i32_9 : i32
    scf.if %11 {
      %c0_10 = arith.constant 0 : index
      %c0_11 = arith.constant 0 : index
      %12 = vector.load %arg7[%c0_10, %c0_11] : memref<16x8xf32, #tpu.memory_space<vmem>>, vector<16x8xf32>
      %c0_12 = arith.constant 0 : index
      %c0_13 = arith.constant 0 : index
      %13 = vector.load %arg5[%c0_12, %c0_13] : memref<1x8xf32, #tpu.memory_space<vmem>>, vector<1x8xf32>
      %14 = vector.broadcast %13 : vector<1x8xf32> to vector<16x8xf32>
      %15 = arith.addf %12, %14 : vector<16x8xf32>
      %cst_14 = arith.constant 0.000000e+00 : f32
      %16 = vector.broadcast %cst_14 : f32 to vector<16x8xf32>
      %17 = arith.maximumf %15, %16 : vector<16x8xf32>
      %c0_15 = arith.constant 0 : index
      %c0_16 = arith.constant 0 : index
      %18 = vector.load %arg6[%c0_15, %c0_16] : memref<16x8xf32, #tpu.memory_space<vmem>>, vector<16x8xf32>
      tpu.vector_store %arg6[%c0_15, %c0_16], %17 {strides = array<i32>} : memref<16x8xf32, #tpu.memory_space<vmem>>, vector<16x8xf32>,
    } else {
    }
    return
  }
  func.func @transform_0(%arg0: i32, %arg1: i32, %arg2: i32) -> (i32, i32) {
    %c0_i32 = arith.constant 0 : i32
    return %arg0, %arg2 : i32, i32
  }
  func.func @transform_1(%arg0: i32, %arg1: i32, %arg2: i32) -> (i32, i32) {
    %c0_i32 = arith.constant 0 : i32
    return %arg2, %arg1 : i32, i32
  }
  func.func @transform_2(%arg0: i32, %arg1: i32, %arg2: i32) -> (i32, i32) {
    %c0_i32 = arith.constant 0 : i32
    %c0_i32_0 = arith.constant 0 : i32
    return %c0_i32, %arg1 : i32, i32
  }
  func.func @transform_3(%arg0: i32, %arg1: i32, %arg2: i32) -> (i32, i32) {
    %c0_i32 = arith.constant 0 : i32
    return %arg0, %arg1 : i32, i32
  }
}

module attributes {stable_mosaic.version = 11 : i64} {
  func.func @_matmul_kernel(%arg0: i32, %arg1: i32, %arg2: i32, %arg3: memref<16x32xf32, #tpu.memory_space<vmem>>, %arg4: memref<32x32xf32, #tpu.memory_space<vmem>>, %arg5: memref<16x32xf32, #tpu.memory_space<vmem>>, %arg6: memref<16x32xf32, #tpu.memory_space<vmem>>) attributes {dimension_semantics = [#tpu.dimension_semantics<parallel>, #tpu.dimension_semantics<parallel>, #tpu.dimension_semantics<arbitrary>], iteration_bounds = array<i64: 1, 1, 1>, scalar_prefetch = 0 : i64, scratch_operands = 1 : i64, tpu.core_type = #tpu.core_type<tc>, window_params = [{transform_indices = @transform_0, window_bounds = array<i64: 16, 32>}, {transform_indices = @transform_1, window_bounds = array<i64: 32, 32>}, {transform_indices = @transform_2, window_bounds = array<i64: 16, 32>}]} {
    %c0_i32 = arith.constant 0 : i32
    %0 = arith.cmpi eq, %arg2, %c0_i32 : i32
    %1 = arith.extui %0 : i1 to i32
    %c0_i32_0 = arith.constant 0 : i32
    %2 = arith.cmpi ne, %1, %c0_i32_0 : i32
    scf.if %2 {
      %cst_10 = arith.constant 0.000000e+00 : f32
      %12 = vector.broadcast %cst_10 : f32 to vector<16x32xf32>
      %c0_11 = arith.constant 0 : index
      %c0_12 = arith.constant 0 : index
      %13 = vector.load %arg6[%c0_11, %c0_12] : memref<16x32xf32, #tpu.memory_space<vmem>>, vector<16x32xf32>
      tpu.vector_store %arg6[%c0_11, %c0_12], %12 {strides = array<i32>} : memref<16x32xf32, #tpu.memory_space<vmem>>, vector<16x32xf32>,
    } else {
    }
    %c0 = arith.constant 0 : index
    %c0_1 = arith.constant 0 : index
    %3 = vector.load %arg6[%c0, %c0_1] : memref<16x32xf32, #tpu.memory_space<vmem>>, vector<16x32xf32>
    %c0_2 = arith.constant 0 : index
    %c0_3 = arith.constant 0 : index
    %4 = vector.load %arg3[%c0_2, %c0_3] : memref<16x32xf32, #tpu.memory_space<vmem>>, vector<16x32xf32>
    %c0_4 = arith.constant 0 : index
    %c0_5 = arith.constant 0 : index
    %5 = vector.load %arg4[%c0_4, %c0_5] : memref<32x32xf32, #tpu.memory_space<vmem>>, vector<32x32xf32>
    %cst = arith.constant dense<0.000000e+00> : vector<16x32xf32>
    %6 = tpu.matmul %4, %5, %cst {dimension_numbers = #tpu.dot_dimension_numbers<[1], [0], [0], [1], [0, 0, 1, 1], [], []>} : vector<16x32xf32>, vector<32x32xf32>, vector<16x32xf32> -> vector<16x32xf32>
    %7 = arith.addf %3, %6 : vector<16x32xf32>
    %c0_6 = arith.constant 0 : index
    %c0_7 = arith.constant 0 : index
    %8 = vector.load %arg6[%c0_6, %c0_7] : memref<16x32xf32, #tpu.memory_space<vmem>>, vector<16x32xf32>
    tpu.vector_store %arg6[%c0_6, %c0_7], %7 {strides = array<i32>} : memref<16x32xf32, #tpu.memory_space<vmem>>, vector<16x32xf32>,
    %c0_i32_8 = arith.constant 0 : i32
    %9 = arith.cmpi eq, %arg2, %c0_i32_8 : i32
    %10 = arith.extui %9 : i1 to i32
    %c0_i32_9 = arith.constant 0 : i32
    %11 = arith.cmpi ne, %10, %c0_i32_9 : i32
    scf.if %11 {
      %c0_10 = arith.constant 0 : index
      %c0_11 = arith.constant 0 : index
      %12 = vector.load %arg6[%c0_10, %c0_11] : memref<16x32xf32, #tpu.memory_space<vmem>>, vector<16x32xf32>
      %c0_12 = arith.constant 0 : index
      %c0_13 = arith.constant 0 : index
      %13 = vector.load %arg5[%c0_12, %c0_13] : memref<16x32xf32, #tpu.memory_space<vmem>>, vector<16x32xf32>
      tpu.vector_store %arg5[%c0_12, %c0_13], %12 {strides = array<i32>} : memref<16x32xf32, #tpu.memory_space<vmem>>, vector<16x32xf32>,
    } else {
    }
    return
  }
  func.func @transform_0(%arg0: i32, %arg1: i32, %arg2: i32) -> (i32, i32) {
    %c0_i32 = arith.constant 0 : i32
    return %arg0, %arg2 : i32, i32
  }
  func.func @transform_1(%arg0: i32, %arg1: i32, %arg2: i32) -> (i32, i32) {
    %c0_i32 = arith.constant 0 : i32
    return %arg2, %arg1 : i32, i32
  }
  func.func @transform_2(%arg0: i32, %arg1: i32, %arg2: i32) -> (i32, i32) {
    %c0_i32 = arith.constant 0 : i32
    return %arg0, %arg1 : i32, i32
  }
}

</mosaic_0001>

<bundles_post_ra>
// kernel: dist_gcn_forward.6
= control target key start
LH: loop header
LB: loop body
LE: loop exit
PB: predicated region body
PF: predicated region fallthrough
CT: control target
= control target key end

     0   :  { %vm15_vm0 = vcmask 130048   ;;  %v159_v2 = vmov 0.0   ;;  %vm42_vm1 = vcmask 523264   ;;  %s259_s1 = inlined_call_operand.vmem [shape: f32[64,16], index: 1, kind: input, shape index: {}]   ;;  %s260_s0 = inlined_call_operand.vmem [shape: f32[48,64], index: 0, kind: input, shape index: {}]   ;;  %s261_s2 = inlined_call_operand.vmem [shape: f32[48,16], index: 2, kind: output, shape index: {}]  }
   0x1   :  { %v41_v0 = vld [vmem:[%s259_s1 + $0x38] sm:$0xff]  ;;  %v40_v1 = vld [vmem:[%s259_s1 + $0x30] sm:$0xff]  ;;  %18 = vst.msk [vmem:[#allocation2 + $0x10] sm:$0xff] %vm15_vm0, %v159_v2  ;;  %v39_v3 = vld [vmem:[%s259_s1 + $0x28] sm:$0xff] }
   0x2   :  { %135 = vmatpush.msra.mxu2 %v41_v0  ;;  %136 = vmatpush.msra.mxu3 %v41_v0  ;;  %16 = vst.msk [vmem:[#allocation2] sm:$0xff] %vm15_vm0, %v159_v2  ;;  %v38_v4 = vld [vmem:[%s259_s1 + $0x20] sm:$0xff]  ;;  %v37_v5 = vld [vmem:[%s259_s1 + $0x18] sm:$0xff]  ;;  %v36_v6 = vld [vmem:[%s259_s1 + $0x10] sm:$0xff] }
   0x3   :  { %69 = vmatpush.msra.mxu0 %v41_v0  ;;  %134 = vmatpush.msra.mxu1 %v41_v0  ;;  %17 = vst.msk [vmem:[#allocation2 + $0x8] sm:$0xff] %vm15_vm0, %v159_v2  ;;  %v35_v7 = vld [vmem:[%s259_s1 + $0x8] sm:$0xff]  ;;  %v34_v8 = vld [vmem:[%s259_s1] sm:$0xff]  ;;  %v30_v9 = vld [vmem:[%s260_s0 + $0x10] sm:$0xff] }
   0x4   :  { %138 = vmatpush.msra.mxu2 %v40_v1  ;;  %139 = vmatpush.msra.mxu3 %v40_v1  ;;  %19 = vst.msk [vmem:[#allocation2 + $0x18] sm:$0xff] %vm15_vm0, %v159_v2  ;;  %v32_v10 = vld [vmem:[%s260_s0 + $0x20] sm:$0xff]  ;;  %v29_v12 = vld [vmem:[%s260_s0 + $0x8] sm:$0xff]  ;;  %v31_v13 = vld [vmem:[%s260_s0 + $0x18] sm:$0xff] }
   0x5   :  { %70 = vmatpush.msra.mxu0 %v40_v1  ;;  %137 = vmatpush.msra.mxu1 %v40_v1  ;;  %20 = vst.msk [vmem:[#allocation2 + $0x20] sm:$0xff] %vm15_vm0, %v159_v2  ;;  %v28_v11 = vld [vmem:[%s260_s0] sm:$0xff]  ;;  %v33_v14 = vld [vmem:[%s260_s0 + $0x28] sm:$0xff] }
   0x6   :  { %141 = vmatpush.msra.mxu2 %v39_v3  ;;  %142 = vmatpush.msra.mxu3 %v39_v3  ;;  %21 = vst.msk [vmem:[#allocation2 + $0x28] sm:$0xff] %vm15_vm0, %v159_v2 }
   0x7   :  { %71 = vmatpush.msra.mxu0 %v39_v3  ;;  %140 = vmatpush.msra.mxu1 %v39_v3 }
   0x8   :  { %144 = vmatpush.msra.mxu2 %v38_v4  ;;  %145 = vmatpush.msra.mxu3 %v38_v4  ;;  %v24_v21 = vld [vmem:[#allocation2 + $0x10] sm:$0xff] }
   0x9   :  { %72 = vmatpush.msra.mxu0 %v38_v4  ;;  %143 = vmatpush.msra.mxu1 %v38_v4  ;;  %v22_v15 = vld [vmem:[#allocation2] sm:$0xff] }
   0xa   :  { %147 = vmatpush.msra.mxu2 %v37_v5  ;;  %148 = vmatpush.msra.mxu3 %v37_v5  ;;  %v23_v16 = vld [vmem:[#allocation2 + $0x8] sm:$0xff] }
   0xb   :  { %73 = vmatpush.msra.mxu0 %v37_v5  ;;  %146 = vmatpush.msra.mxu1 %v37_v5  ;;  %v25_v28 = vld [vmem:[#allocation2 + $0x18] sm:$0xff] }
   0xc   :  { %150 = vmatpush.msra.mxu2 %v36_v6  ;;  %151 = vmatpush.msra.mxu3 %v36_v6  ;;  %v26_v22 = vld [vmem:[#allocation2 + $0x20] sm:$0xff] }
   0xd   :  { %74 = vmatpush.msra.mxu0 %v36_v6  ;;  %149 = vmatpush.msra.mxu1 %v36_v6  ;;  %v27_v30 = vld [vmem:[#allocation2 + $0x28] sm:$0xff] }
   0xe   :  { %153 = vmatpush.msra.mxu2 %v35_v7  ;;  %154 = vmatpush.msra.mxu3 %v35_v7 }
   0xf   :  { %75 = vmatpush.msra.mxu0 %v35_v7  ;;  %152 = vmatpush.msra.mxu1 %v35_v7 }
  0x10   :  { %156 = vmatpush.msra.mxu2 %v34_v8  ;;  %157 = vmatpush.msra.mxu3 %v34_v8 }
  0x11   :  { %130 = vmatmul.msk.f32.vlgmr.msra.gmra.mxu2 %vm42_vm1, %v30_v9  ;;  %132 = vmatmul.msk.f32.vlgmr.msra.gmra.mxu3 %vm42_vm1, %v32_v10 }
  0x12   :  { %76 = vmatpush.msra.mxu0 %v34_v8  ;;  %155 = vmatpush.msra.mxu1 %v34_v8 }
  0x13   :  { %128 = vmatmul.msk.f32.vlgmr.msra.gmra.mxu0 %vm42_vm1, %v28_v11  ;;  %129 = vmatmul.msk.f32.vlgmr.msra.gmra.mxu1 %vm42_vm1, %v29_v12 }
  0x19   :  { %131 = vmatmul.msk.f32.gmra.mxu2 %vm42_vm1, %v31_v13  ;;  %133 = vmatmul.msk.f32.gmra.mxu3 %vm42_vm1, %v33_v14 }
  0x90   :  { %v78_v17 = vpop.f32.mrf.mxu0  ;;  %v81_v18 = vpop.f32.mrf.mxu1 }
  0x91   :  { %v96_v19 = vadd.f32 %v78_v17, %v22_v15  ;;  %v97_v20 = vadd.f32 %v81_v18, %v23_v16 }
  0x93   :  { %103 = vst.msk [vmem:[#allocation2] sm:$0xff] %vm15_vm0, %v96_v19 }
  0x94   :  { %v84_v23 = vpop.f32.mrf.mxu2  ;;  %v90_v24 = vpop.f32.mrf.mxu3  ;;  %104 = vst.msk [vmem:[#allocation2 + $0x8] sm:$0xff] %vm15_vm0, %v97_v20 }
  0x95   :  { %v98_v25 = vadd.f32 %v84_v23, %v24_v21  ;;  %v100_v26 = vadd.f32 %v90_v24, %v26_v22 }
  0x97   :  { %105 = vst.msk [vmem:[#allocation2 + $0x10] sm:$0xff] %vm15_vm0, %v98_v25 }
  0x98   :  { %107 = vst.msk [vmem:[#allocation2 + $0x20] sm:$0xff] %vm15_vm0, %v100_v26 }
  0x9a   :  { %v112_v27 = vld [vmem:[#allocation2] sm:$0xff] }
  0x9b   :  { %118 = vst.msk [vmem:[%s261_s2] sm:$0xff] %vm15_vm0, %v112_v27  ;;  %v113_v29 = vld [vmem:[#allocation2 + $0x8] sm:$0xff] }
  0x9c   :  { %119 = vst.msk [vmem:[%s261_s2 + $0x8] sm:$0xff] %vm15_vm0, %v113_v29  ;;  %v87_v31 = vpop.f32.mrf.mxu2  ;;  %v93_v32 = vpop.f32.mrf.mxu3 }
  0x9d   :  { %v99_v33 = vadd.f32 %v87_v31, %v25_v28  ;;  %v101_v35 = vadd.f32 %v93_v32, %v27_v30 }
  0x9e   :  { %v114_v34 = vld [vmem:[#allocation2 + $0x10] sm:$0xff] }
  0x9f   :  { %120 = vst.msk [vmem:[%s261_s2 + $0x10] sm:$0xff] %vm15_vm0, %v114_v34  ;;  %v116_v36 = vld [vmem:[#allocation2 + $0x20] sm:$0xff] }
  0xa0   :  { %122 = vst.msk [vmem:[%s261_s2 + $0x20] sm:$0xff] %vm15_vm0, %v116_v36 }
  0xa1   :  { %106 = vst.msk [vmem:[#allocation2 + $0x18] sm:$0xff] %vm15_vm0, %v99_v33 }
  0xa2   :  { %108 = vst.msk [vmem:[#allocation2 + $0x28] sm:$0xff] %vm15_vm0, %v101_v35 }
  0xa8   :  { %v115_v37 = vld [vmem:[#allocation2 + $0x18] sm:$0xff] }
  0xa9   :  { %121 = vst.msk [vmem:[%s261_s2 + $0x18] sm:$0xff] %vm15_vm0, %v115_v37  ;;  %v117_v38 = vld [vmem:[#allocation2 + $0x28] sm:$0xff] }
  0xaa   :  { %123 = vst.msk [vmem:[%s261_s2 + $0x28] sm:$0xff] %vm15_vm0, %v117_v38 }

// kernel: dist_gcn_forward.7
= control target key start
LH: loop header
LB: loop body
LE: loop exit
PB: predicated region body
PF: predicated region fallthrough
CT: control target
= control target key end

     0   :  { %8 = vsyncpa [#allocation4], 0  ;;  %s201_s15 = smov [#allocation3]   ;;  %s202_s17 = smov 128   ;;  %s291_s0 = inlined_call_operand.vmem [shape: f32[48,16], index: 0, kind: input, shape index: {}]   ;;  %s292_s1 = inlined_call_operand.hbm [shape: f32[16,32], index: 1, kind: input, shape index: {}]   ;;  %s293_s2 = inlined_call_operand.vmem [shape: f32[1,32], index: 2, kind: input, shape index: {}]   ;;  %s294_s3 = inlined_call_operand.vmem [shape: f32[48,32], index: 3, kind: output, shape index: {}]  }
   0x1   :  { %s15_s14 = sshll.u32 %s292_s1, 4  ;;  %s17_s16 = sshll.u32 %s201_s15, 4  ;;  %s16_s14 = int_to_ptr.hbm [resolvable:$true] %s15_s14  ;;  %s18_s16 = int_to_ptr.vmem [resolvable:$true] %s17_s16 }
   0x2   :  { %s203_s18 = smov 8  }
   0x3   :  { %23 = dma.hbm_to_vmem [thread:$0]  %s16_s14, 256, %s18_s16, [#allocation4], %s202_s17, %s202_s17, %s203_s18  }
   0x4   :  { %199 = dma.done.wait [#allocation4], 256  }
   0x5   :  { %200 = vsyncadd [#allocation4], 4294967040  ;;  %vm34_vm0 = vcmask 261120   ;;  %v204_v0 = vmov 0.0   ;;  %v54_v1 = vld [vmem:[#allocation3 + $0x8] sm:$0xff]  ;;  %v53_v2 = vld [vmem:[#allocation3] sm:$0xff] }
   0x6   :  { %36 = vst.msk [vmem:[#allocation2 + $0x8] sm:$0xff] %vm34_vm0, %v204_v0  ;;  %165 = vmatpush.msra.mxu2 %v54_v1  ;;  %v50_v3 = vld [vmem:[%s291_s0 + $0x18] sm:$0xff]  ;;  %vm55_vm1 = vcmask 130048   ;;  %164 = vmatpush.msra.mxu1 %v54_v1  ;;  %v48_v4 = vld [vmem:[%s291_s0 + $0x8] sm:$0xff]  ;;  %v47_v6 = vld [vmem:[%s291_s0] sm:$0xff] }
   0x7   :  { %35 = vst.msk [vmem:[#allocation2] sm:$0xff] %vm34_vm0, %v204_v0  ;;  %166 = vmatpush.msra.mxu3 %v54_v1  ;;  %88 = vmatpush.msra.mxu0 %v54_v1  ;;  %v52_v5 = vld [vmem:[%s291_s0 + $0x28] sm:$0xff]  ;;  %v51_v7 = vld [vmem:[%s291_s0 + $0x20] sm:$0xff]  ;;  %v49_v8 = vld [vmem:[%s291_s0 + $0x10] sm:$0xff] }
   0x8   :  { %37 = vst.msk [vmem:[#allocation2 + $0x10] sm:$0xff] %vm34_vm0, %v204_v0  ;;  %168 = vmatpush.msra.mxu2 %v53_v2  ;;  %167 = vmatpush.msra.mxu1 %v53_v2  ;;  %v174_v19 = vld [vmem:[%s293_s2] ss:$0 sm:$0xff] }
   0x9   :  { %38 = vst.msk [vmem:[#allocation2 + $0x18] sm:$0xff] %vm34_vm0, %v204_v0  ;;  %161 = vmatmul.msk.f32.vlgmr.msra.gmra.mxu2 %vm55_vm1, %v50_v3  ;;  %159 = vmatmul.msk.f32.vlgmr.msra.gmra.mxu1 %vm55_vm1, %v48_v4 }
   0xa   :  { %39 = vst.msk [vmem:[#allocation2 + $0x20] sm:$0xff] %vm34_vm0, %v204_v0  ;;  %169 = vmatpush.msra.mxu3 %v53_v2  ;;  %89 = vmatpush.msra.mxu0 %v53_v2 }
   0xb   :  { %40 = vst.msk [vmem:[#allocation2 + $0x28] sm:$0xff] %vm34_vm0, %v204_v0  ;;  %163 = vmatmul.msk.f32.vlgmr.msra.gmra.mxu3 %vm55_vm1, %v52_v5  ;;  %158 = vmatmul.msk.f32.vlgmr.msra.gmra.mxu0 %vm55_vm1, %v47_v6 }
   0xd   :  { %v42_v9 = vld [vmem:[#allocation2 + $0x8] sm:$0xff] }
   0xe   :  { %v41_v11 = vld [vmem:[#allocation2] sm:$0xff] }
   0xf   :  { %v43_v17 = vld [vmem:[#allocation2 + $0x10] sm:$0xff] }
  0x10   :  { %v44_v15 = vld [vmem:[#allocation2 + $0x18] sm:$0xff] }
  0x11   :  { %162 = vmatmul.msk.f32.gmra.mxu2 %vm55_vm1, %v51_v7  ;;  %160 = vmatmul.msk.f32.gmra.mxu1 %vm55_vm1, %v49_v8  ;;  %v45_v28 = vld [vmem:[#allocation2 + $0x20] sm:$0xff] }
  0x12   :  { %v46_v18 = vld [vmem:[#allocation2 + $0x28] sm:$0xff] }
  0x86   :  { %v94_v10 = vpop.f32.mrf.mxu1 }
  0x87   :  { %v110_v12 = vadd.f32 %v94_v10, %v42_v9 }
  0x88   :  { %v91_v13 = vpop.f32.mrf.mxu0 }
  0x89   :  { %117 = vst.msk [vmem:[#allocation2 + $0x8] sm:$0xff] %vm34_vm0, %v110_v12  ;;  %v109_v14 = vadd.f32 %v91_v13, %v41_v11 }
  0x8b   :  { %116 = vst.msk [vmem:[#allocation2] sm:$0xff] %vm34_vm0, %v109_v14 }
  0x8c   :  { %v100_v16 = vpop.f32.mrf.mxu2 }
  0x8d   :  { %v112_v20 = vadd.f32 %v100_v16, %v44_v15 }
  0x8e   :  { %v97_v21 = vpop.f32.mrf.mxu1  ;;  %v106_v22 = vpop.f32.mrf.mxu3 }
  0x8f   :  { %119 = vst.msk [vmem:[#allocation2 + $0x18] sm:$0xff] %vm34_vm0, %v112_v20  ;;  %v111_v23 = vadd.f32 %v97_v21, %v43_v17  ;;  %v114_v24 = vadd.f32 %v106_v22, %v46_v18 }
  0x90   :  { %v126_v25 = vld [vmem:[#allocation2 + $0x8] sm:$0xff] }
  0x91   :  { %v136_v26 = vadd.f32 %v174_v19, %v126_v25  ;;  %118 = vst.msk [vmem:[#allocation2 + $0x10] sm:$0xff] %vm34_vm0, %v111_v23 }
  0x92   :  { %v125_v27 = vld [vmem:[#allocation2] sm:$0xff]  ;;  %121 = vst.msk [vmem:[#allocation2 + $0x28] sm:$0xff] %vm34_vm0, %v114_v24 }
  0x93   :  { %v142_v29 = vmax.f32 %v136_v26, 0.0  ;;  %v135_v30 = vadd.f32 %v174_v19, %v125_v27 }
  0x94   :  { %v103_v31 = vpop.f32.mrf.mxu2 }
  0x95   :  { %148 = vst.msk [vmem:[%s294_s3 + $0x8] sm:$0xff] %vm34_vm0, %v142_v29  ;;  %v141_v32 = vmax.f32 %v135_v30, 0.0  ;;  %v113_v33 = vadd.f32 %v103_v31, %v45_v28 }
  0x96   :  { %v128_v34 = vld [vmem:[#allocation2 + $0x18] sm:$0xff] }
  0x97   :  { %v138_v35 = vadd.f32 %v174_v19, %v128_v34  ;;  %147 = vst.msk [vmem:[%s294_s3] sm:$0xff] %vm34_vm0, %v141_v32 }
  0x98   :  { %v127_v36 = vld [vmem:[#allocation2 + $0x10] sm:$0xff]  ;;  %120 = vst.msk [vmem:[#allocation2 + $0x20] sm:$0xff] %vm34_vm0, %v113_v33 }
  0x99   :  { %v144_v37 = vmax.f32 %v138_v35, 0.0  ;;  %v137_v38 = vadd.f32 %v174_v19, %v127_v36  ;;  %v130_v39 = vld [vmem:[#allocation2 + $0x28] sm:$0xff] }
  0x9a   :  { %v140_v40 = vadd.f32 %v174_v19, %v130_v39 }
  0x9b   :  { %150 = vst.msk [vmem:[%s294_s3 + $0x18] sm:$0xff] %vm34_vm0, %v144_v37  ;;  %v143_v41 = vmax.f32 %v137_v38, 0.0 }
  0x9c   :  { %v146_v42 = vmax.f32 %v140_v40, 0.0 }
  0x9d   :  { %149 = vst.msk [vmem:[%s294_s3 + $0x10] sm:$0xff] %vm34_vm0, %v143_v41 }
  0x9e   :  { %152 = vst.msk [vmem:[%s294_s3 + $0x28] sm:$0xff] %vm34_vm0, %v146_v42 }
  0x9f   :  { %v129_v43 = vld [vmem:[#allocation2 + $0x20] sm:$0xff] }
  0xa0   :  { %v139_v44 = vadd.f32 %v174_v19, %v129_v43 }
  0xa2   :  { %v145_v45 = vmax.f32 %v139_v44, 0.0 }
  0xa4   :  { %151 = vst.msk [vmem:[%s294_s3 + $0x20] sm:$0xff] %vm34_vm0, %v145_v45 }
  0xa5   :  { %157 = vsyncpa [#allocation4], 1 }

// kernel: dist_gcn_forward.8
= control target key start
LH: loop header
LB: loop body
LE: loop exit
PB: predicated region body
PF: predicated region fallthrough
CT: control target
= control target key end

     0   :  { %vm15_vm0 = vcmask 261120   ;;  %v123_v2 = vmov 0.0   ;;  %vm34_vm1 = vcmask 392192   ;;  %s193_s1 = inlined_call_operand.vmem [shape: f32[48,32], index: 1, kind: input, shape index: {}]   ;;  %s194_s0 = inlined_call_operand.vmem [shape: f32[32,48], index: 0, kind: input, shape index: {}]   ;;  %s195_s2 = inlined_call_operand.vmem [shape: f32[32,32], index: 2, kind: output, shape index: {}]  }
   0x1   :  { %v33_v0 = vld [vmem:[%s193_s1 + $0x28] sm:$0xff]  ;;  %v32_v1 = vld [vmem:[%s193_s1 + $0x20] sm:$0xff]  ;;  %16 = vst.msk [vmem:[#allocation2] sm:$0xff] %vm15_vm0, %v123_v2  ;;  %v31_v3 = vld [vmem:[%s193_s1 + $0x18] sm:$0xff] }
   0x2   :  { %105 = vmatpush.msra.mxu2 %v33_v0  ;;  %106 = vmatpush.msra.mxu3 %v33_v0  ;;  %17 = vst.msk [vmem:[#allocation2 + $0x8] sm:$0xff] %vm15_vm0, %v123_v2  ;;  %v30_v4 = vld [vmem:[%s193_s1 + $0x10] sm:$0xff]  ;;  %v29_v5 = vld [vmem:[%s193_s1 + $0x8] sm:$0xff]  ;;  %v28_v6 = vld [vmem:[%s193_s1] sm:$0xff] }
   0x3   :  { %57 = vmatpush.msra.mxu0 %v33_v0  ;;  %104 = vmatpush.msra.mxu1 %v33_v0  ;;  %18 = vst.msk [vmem:[#allocation2 + $0x10] sm:$0xff] %vm15_vm0, %v123_v2  ;;  %v26_v7 = vld [vmem:[%s194_s0 + $0x10] sm:$0xff]  ;;  %v27_v8 = vld [vmem:[%s194_s0 + $0x18] sm:$0xff]  ;;  %v24_v9 = vld [vmem:[%s194_s0] sm:$0xff] }
   0x4   :  { %108 = vmatpush.msra.mxu2 %v32_v1  ;;  %109 = vmatpush.msra.mxu3 %v32_v1  ;;  %19 = vst.msk [vmem:[#allocation2 + $0x18] sm:$0xff] %vm15_vm0, %v123_v2  ;;  %v25_v10 = vld [vmem:[%s194_s0 + $0x8] sm:$0xff] }
   0x5   :  { %58 = vmatpush.msra.mxu0 %v32_v1  ;;  %107 = vmatpush.msra.mxu1 %v32_v1 }
   0x6   :  { %111 = vmatpush.msra.mxu2 %v31_v3  ;;  %112 = vmatpush.msra.mxu3 %v31_v3 }
   0x7   :  { %59 = vmatpush.msra.mxu0 %v31_v3  ;;  %110 = vmatpush.msra.mxu1 %v31_v3 }
   0x8   :  { %114 = vmatpush.msra.mxu2 %v30_v4  ;;  %115 = vmatpush.msra.mxu3 %v30_v4  ;;  %v20_v11 = vld [vmem:[#allocation2] sm:$0xff] }
   0x9   :  { %60 = vmatpush.msra.mxu0 %v30_v4  ;;  %113 = vmatpush.msra.mxu1 %v30_v4  ;;  %v21_v12 = vld [vmem:[#allocation2 + $0x8] sm:$0xff] }
   0xa   :  { %117 = vmatpush.msra.mxu2 %v29_v5  ;;  %118 = vmatpush.msra.mxu3 %v29_v5  ;;  %v22_v17 = vld [vmem:[#allocation2 + $0x10] sm:$0xff] }
   0xb   :  { %61 = vmatpush.msra.mxu0 %v29_v5  ;;  %116 = vmatpush.msra.mxu1 %v29_v5  ;;  %v23_v18 = vld [vmem:[#allocation2 + $0x18] sm:$0xff] }
   0xc   :  { %120 = vmatpush.msra.mxu2 %v28_v6  ;;  %121 = vmatpush.msra.mxu3 %v28_v6 }
   0xd   :  { %102 = vmatmul.msk.f32.vlgmr.msra.gmra.mxu2 %vm34_vm1, %v26_v7  ;;  %103 = vmatmul.msk.f32.vlgmr.msra.gmra.mxu3 %vm34_vm1, %v27_v8 }
   0xe   :  { %62 = vmatpush.msra.mxu0 %v28_v6  ;;  %119 = vmatpush.msra.mxu1 %v28_v6 }
   0xf   :  { %100 = vmatmul.msk.f32.vlgmr.msra.gmra.mxu0 %vm34_vm1, %v24_v9  ;;  %101 = vmatmul.msk.f32.vlgmr.msra.gmra.mxu1 %vm34_vm1, %v25_v10 }
  0x8c   :  { %v64_v13 = vpop.f32.mrf.mxu0  ;;  %v67_v14 = vpop.f32.mrf.mxu1 }
  0x8d   :  { %v76_v15 = vadd.f32 %v64_v13, %v20_v11  ;;  %v77_v16 = vadd.f32 %v67_v14, %v21_v12 }
  0x8f   :  { %81 = vst.msk [vmem:[#allocation2] sm:$0xff] %vm15_vm0, %v76_v15 }
  0x90   :  { %82 = vst.msk [vmem:[#allocation2 + $0x8] sm:$0xff] %vm15_vm0, %v77_v16  ;;  %v70_v19 = vpop.f32.mrf.mxu2  ;;  %v73_v20 = vpop.f32.mrf.mxu3 }
  0x91   :  { %v78_v21 = vadd.f32 %v70_v19, %v22_v17  ;;  %v79_v22 = vadd.f32 %v73_v20, %v23_v18 }
  0x93   :  { %83 = vst.msk [vmem:[#allocation2 + $0x10] sm:$0xff] %vm15_vm0, %v78_v21 }
  0x94   :  { %84 = vst.msk [vmem:[#allocation2 + $0x18] sm:$0xff] %vm15_vm0, %v79_v22 }
  0x96   :  { %v88_v23 = vld [vmem:[#allocation2] sm:$0xff] }
  0x97   :  { %92 = vst.msk [vmem:[%s195_s2] sm:$0xff] %vm15_vm0, %v88_v23  ;;  %v89_v24 = vld [vmem:[#allocation2 + $0x8] sm:$0xff] }
  0x98   :  { %93 = vst.msk [vmem:[%s195_s2 + $0x8] sm:$0xff] %vm15_vm0, %v89_v24 }
  0x9a   :  { %v90_v25 = vld [vmem:[#allocation2 + $0x10] sm:$0xff] }
  0x9b   :  { %94 = vst.msk [vmem:[%s195_s2 + $0x10] sm:$0xff] %vm15_vm0, %v90_v25  ;;  %v91_v26 = vld [vmem:[#allocation2 + $0x18] sm:$0xff] }
  0x9c   :  { %95 = vst.msk [vmem:[%s195_s2 + $0x18] sm:$0xff] %vm15_vm0, %v91_v26 }

// kernel: dist_gcn_forward.9
= control target key start
LH: loop header
LB: loop body
LE: loop exit
PB: predicated region body
PF: predicated region fallthrough
CT: control target
= control target key end

     0   :  { %8 = vsyncpa [#allocation4], 0  ;;  %s176_s15 = smov [#allocation3]   ;;  %s177_s17 = smov 128   ;;  %s246_s0 = inlined_call_operand.vmem [shape: f32[32,32], index: 0, kind: input, shape index: {}]   ;;  %s247_s1 = inlined_call_operand.hbm [shape: f32[32,32], index: 1, kind: input, shape index: {}]   ;;  %s248_s2 = inlined_call_operand.vmem [shape: f32[1,32], index: 2, kind: input, shape index: {}]   ;;  %s249_s3 = inlined_call_operand.vmem [shape: f32[32,32], index: 3, kind: output, shape index: {}]  }
   0x1   :  { %s15_s14 = sshll.u32 %s247_s1, 4  ;;  %s17_s16 = sshll.u32 %s176_s15, 4  ;;  %s16_s14 = int_to_ptr.hbm [resolvable:$true] %s15_s14  ;;  %s18_s16 = int_to_ptr.vmem [resolvable:$true] %s17_s16 }
   0x2   :  { %s178_s18 = smov 8  }
   0x3   :  { %23 = dma.hbm_to_vmem [thread:$0]  %s16_s14, 512, %s18_s16, [#allocation4], %s177_s17, %s177_s17, %s178_s18  }
   0x4   :  { %174 = dma.done.wait [#allocation4], 512  }
   0x5   :  { %175 = vsyncadd [#allocation4], 4294966784  ;;  %vm34_vm0 = vcmask 261120   ;;  %v179_v0 = vmov 0.0   ;;  %v50_v1 = vld [vmem:[#allocation3 + $0x18] sm:$0xff]  ;;  %v49_v2 = vld [vmem:[#allocation3 + $0x10] sm:$0xff] }
   0x6   :  { %35 = vst.msk [vmem:[#allocation2] sm:$0xff] %vm34_vm0, %v179_v0  ;;  %134 = vmatpush.msra.mxu2 %v50_v1  ;;  %135 = vmatpush.msra.mxu3 %v50_v1  ;;  %v48_v3 = vld [vmem:[#allocation3 + $0x8] sm:$0xff]  ;;  %v47_v4 = vld [vmem:[#allocation3] sm:$0xff]  ;;  %v45_v5 = vld [vmem:[%s246_s0 + $0x10] sm:$0xff] }
   0x7   :  { %36 = vst.msk [vmem:[#allocation2 + $0x8] sm:$0xff] %vm34_vm0, %v179_v0  ;;  %76 = vmatpush.msra.mxu0 %v50_v1  ;;  %133 = vmatpush.msra.mxu1 %v50_v1  ;;  %v46_v6 = vld [vmem:[%s246_s0 + $0x18] sm:$0xff]  ;;  %v43_v7 = vld [vmem:[%s246_s0] sm:$0xff]  ;;  %v44_v8 = vld [vmem:[%s246_s0 + $0x8] sm:$0xff] }
   0x8   :  { %37 = vst.msk [vmem:[#allocation2 + $0x10] sm:$0xff] %vm34_vm0, %v179_v0  ;;  %137 = vmatpush.msra.mxu2 %v49_v2  ;;  %138 = vmatpush.msra.mxu3 %v49_v2  ;;  %v149_v21 = vld [vmem:[%s248_s2] ss:$0 sm:$0xff] }
   0x9   :  { %38 = vst.msk [vmem:[#allocation2 + $0x18] sm:$0xff] %vm34_vm0, %v179_v0  ;;  %77 = vmatpush.msra.mxu0 %v49_v2  ;;  %136 = vmatpush.msra.mxu1 %v49_v2 }
   0xa   :  { %140 = vmatpush.msra.mxu2 %v48_v3  ;;  %141 = vmatpush.msra.mxu3 %v48_v3 }
   0xb   :  { %78 = vmatpush.msra.mxu0 %v48_v3  ;;  %139 = vmatpush.msra.mxu1 %v48_v3 }
   0xc   :  { %143 = vmatpush.msra.mxu2 %v47_v4  ;;  %144 = vmatpush.msra.mxu3 %v47_v4 }
   0xd   :  { %131 = vmatmul.msk.f32.vlgmr.msra.gmra.mxu2 %vm34_vm0, %v45_v5  ;;  %132 = vmatmul.msk.f32.vlgmr.msra.gmra.mxu3 %vm34_vm0, %v46_v6  ;;  %v39_v9 = vld [vmem:[#allocation2] sm:$0xff] }
   0xe   :  { %79 = vmatpush.msra.mxu0 %v47_v4  ;;  %142 = vmatpush.msra.mxu1 %v47_v4  ;;  %v40_v10 = vld [vmem:[#allocation2 + $0x8] sm:$0xff] }
   0xf   :  { %129 = vmatmul.msk.f32.vlgmr.msra.gmra.mxu0 %vm34_vm0, %v43_v7  ;;  %130 = vmatmul.msk.f32.vlgmr.msra.gmra.mxu1 %vm34_vm0, %v44_v8  ;;  %v41_v15 = vld [vmem:[#allocation2 + $0x10] sm:$0xff] }
  0x10   :  { %v42_v16 = vld [vmem:[#allocation2 + $0x18] sm:$0xff] }
  0x8c   :  { %v81_v11 = vpop.f32.mrf.mxu0  ;;  %v84_v12 = vpop.f32.mrf.mxu1 }
  0x8d   :  { %v93_v13 = vadd.f32 %v81_v11, %v39_v9  ;;  %v94_v14 = vadd.f32 %v84_v12, %v40_v10 }
  0x8f   :  { %97 = vst.msk [vmem:[#allocation2] sm:$0xff] %vm34_vm0, %v93_v13 }
  0x90   :  { %98 = vst.msk [vmem:[#allocation2 + $0x8] sm:$0xff] %vm34_vm0, %v94_v14  ;;  %v87_v17 = vpop.f32.mrf.mxu2  ;;  %v90_v18 = vpop.f32.mrf.mxu3 }
  0x91   :  { %v95_v19 = vadd.f32 %v87_v17, %v41_v15  ;;  %v96_v20 = vadd.f32 %v90_v18, %v42_v16 }
  0x93   :  { %99 = vst.msk [vmem:[#allocation2 + $0x10] sm:$0xff] %vm34_vm0, %v95_v19 }
  0x94   :  { %100 = vst.msk [vmem:[#allocation2 + $0x18] sm:$0xff] %vm34_vm0, %v96_v20 }
  0x96   :  { %v104_v22 = vld [vmem:[#allocation2] sm:$0xff] }
  0x97   :  { %v112_v23 = vadd.f32 %v149_v21, %v104_v22  ;;  %v105_v24 = vld [vmem:[#allocation2 + $0x8] sm:$0xff] }
  0x98   :  { %v113_v25 = vadd.f32 %v149_v21, %v105_v24 }
  0x99   :  { %v116_v26 = vmax.f32 %v112_v23, 0.0 }
  0x9a   :  { %v117_v27 = vmax.f32 %v113_v25, 0.0  ;;  %v106_v28 = vld [vmem:[#allocation2 + $0x10] sm:$0xff] }
  0x9b   :  { %120 = vst.msk [vmem:[%s249_s3] sm:$0xff] %vm34_vm0, %v116_v26  ;;  %v114_v29 = vadd.f32 %v149_v21, %v106_v28  ;;  %v107_v30 = vld [vmem:[#allocation2 + $0x18] sm:$0xff] }
  0x9c   :  { %121 = vst.msk [vmem:[%s249_s3 + $0x8] sm:$0xff] %vm34_vm0, %v117_v27  ;;  %v115_v31 = vadd.f32 %v149_v21, %v107_v30 }
  0x9d   :  { %v118_v32 = vmax.f32 %v114_v29, 0.0 }
  0x9e   :  { %v119_v33 = vmax.f32 %v115_v31, 0.0 }
  0x9f   :  { %122 = vst.msk [vmem:[%s249_s3 + $0x10] sm:$0xff] %vm34_vm0, %v118_v32 }
  0xa0   :  { %123 = vst.msk [vmem:[%s249_s3 + $0x18] sm:$0xff] %vm34_vm0, %v119_v33 }
  0xa1   :  { %128 = vsyncpa [#allocation4], 1 }

// kernel: dist_gcn_forward.10
= control target key start
LH: loop header
LB: loop body
LE: loop exit
PB: predicated region body
PF: predicated region fallthrough
CT: control target
= control target key end

     0   :  { %7 = vsyncpa [#allocation4], 0  ;;  %s124_s12 = smov [#allocation3]   ;;  %s125_s14 = smov 128   ;;  %s172_s0 = inlined_call_operand.hbm [shape: f32[16,32], index: 0, kind: input, shape index: {}]   ;;  %s173_s1 = inlined_call_operand.vmem [shape: f32[32,32], index: 1, kind: input, shape index: {}]   ;;  %s174_s2 = inlined_call_operand.vmem [shape: f32[16,32], index: 2, kind: output, shape index: {}]  }
   0x1   :  { %s12_s11 = sshll.u32 %s172_s0, 4  ;;  %s14_s13 = sshll.u32 %s124_s12, 4  ;;  %s13_s11 = int_to_ptr.hbm [resolvable:$true] %s12_s11  ;;  %s15_s13 = int_to_ptr.vmem [resolvable:$true] %s14_s13 }
   0x2   :  { %s126_s15 = smov 8  }
   0x3   :  { %20 = dma.hbm_to_vmem [thread:$0]  %s13_s11, 256, %s15_s13, [#allocation4], %s125_s14, %s125_s14, %s126_s15  }
   0x4   :  { %122 = dma.done.wait [#allocation4], 256  }
   0x5   :  { %123 = vsyncadd [#allocation4], 4294967040  ;;  %vm31_vm0 = vcmask 261120   ;;  %v127_v0 = vmov 0.0   ;;  %v41_v1 = vld [vmem:[%s173_s1 + $0x18] sm:$0xff]  ;;  %v40_v2 = vld [vmem:[%s173_s1 + $0x10] sm:$0xff] }
   0x6   :  { %32 = vst.msk [vmem:[#allocation2] sm:$0xff] %vm31_vm0, %v127_v0  ;;  %61 = vmatpush.msra.mxu0 %v41_v1  ;;  %90 = vmatpush.msra.mxu1 %v41_v1  ;;  %v39_v3 = vld [vmem:[%s173_s1 + $0x8] sm:$0xff]  ;;  %v38_v4 = vld [vmem:[%s173_s1] sm:$0xff]  ;;  %v36_v5 = vld [vmem:[#allocation3] sm:$0xff] }
   0x7   :  { %33 = vst.msk [vmem:[#allocation2 + $0x8] sm:$0xff] %vm31_vm0, %v127_v0  ;;  %v37_v6 = vld [vmem:[#allocation3 + $0x8] sm:$0xff] }
   0x8   :  { %62 = vmatpush.msra.mxu0 %v40_v2  ;;  %91 = vmatpush.msra.mxu1 %v40_v2 }
   0xa   :  { %63 = vmatpush.msra.mxu0 %v39_v3  ;;  %92 = vmatpush.msra.mxu1 %v39_v3 }
   0xc   :  { %64 = vmatpush.msra.mxu0 %v38_v4  ;;  %93 = vmatpush.msra.mxu1 %v38_v4 }
   0xd   :  { %88 = vmatmul.msk.f32.vlgmr.msra.gmra.mxu0 %vm31_vm0, %v36_v5  ;;  %89 = vmatmul.msk.f32.vlgmr.msra.gmra.mxu1 %vm31_vm0, %v37_v6  ;;  %v34_v7 = vld [vmem:[#allocation2] sm:$0xff] }
   0xe   :  { %v35_v8 = vld [vmem:[#allocation2 + $0x8] sm:$0xff] }
  0x8a   :  { %v66_v9 = vpop.f32.mrf.mxu0  ;;  %v69_v10 = vpop.f32.mrf.mxu1 }
  0x8b   :  { %v72_v11 = vadd.f32 %v66_v9, %v34_v7  ;;  %v73_v12 = vadd.f32 %v69_v10, %v35_v8 }
  0x8d   :  { %74 = vst.msk [vmem:[#allocation2] sm:$0xff] %vm31_vm0, %v72_v11 }
  0x8e   :  { %75 = vst.msk [vmem:[#allocation2 + $0x8] sm:$0xff] %vm31_vm0, %v73_v12 }
  0x94   :  { %v79_v13 = vld [vmem:[#allocation2] sm:$0xff] }
  0x95   :  { %81 = vst.msk [vmem:[%s174_s2] sm:$0xff] %vm31_vm0, %v79_v13  ;;  %v80_v14 = vld [vmem:[#allocation2 + $0x8] sm:$0xff] }
  0x96   :  { %82 = vst.msk [vmem:[%s174_s2 + $0x8] sm:$0xff] %vm31_vm0, %v80_v14 }
  0x97   :  { %87 = vsyncpa [#allocation4], 1 }

// kernel: dist_gcn_forward.11
= control target key start
LH: loop header
LB: loop body
LE: loop exit
PB: predicated region body
PF: predicated region fallthrough
CT: control target
= control target key end

     0   :  { %vm18_vm0 = vcmask 64512   ;;  %v91_v2 = vmov 0.0   ;;  %vm29_vm1 = vcmask 261120   ;;  %s145_s1 = inlined_call_operand.vmem [shape: f32[32,8], index: 1, kind: input, shape index: {}]   ;;  %s146_s2 = inlined_call_operand.vmem [shape: f32[1,8], index: 2, kind: input, shape index: {}]   ;;  %s147_s0 = inlined_call_operand.vmem [shape: f32[16,32], index: 0, kind: input, shape index: {}]   ;;  %s148_s3 = inlined_call_operand.vmem [shape: f32[16,8], index: 3, kind: output, shape index: {}]  }
   0x1   :  { %v28_v0 = vld [vmem:[%s145_s1 + $0x18] sm:$0xff]  ;;  %v27_v1 = vld [vmem:[%s145_s1 + $0x10] sm:$0xff]  ;;  %19 = vst.msk [vmem:[#allocation2] sm:$0xff] %vm18_vm0, %v91_v2  ;;  %v26_v3 = vld [vmem:[%s145_s1 + $0x8] sm:$0xff] }
   0x2   :  { %48 = vmatpush.msra.mxu0 %v28_v0  ;;  %85 = vmatpush.msra.mxu1 %v28_v0  ;;  %20 = vst.msk [vmem:[#allocation2 + $0x8] sm:$0xff] %vm18_vm0, %v91_v2  ;;  %v25_v4 = vld [vmem:[%s145_s1] sm:$0xff]  ;;  %v24_v6 = vld [vmem:[%s147_s0 + $0x8] sm:$0xff] }
   0x3   :  { %v23_v5 = vld [vmem:[%s147_s0] sm:$0xff] }
   0x4   :  { %49 = vmatpush.msra.mxu0 %v27_v1  ;;  %86 = vmatpush.msra.mxu1 %v27_v1  ;;  %v90_v13 = vld [vmem:[%s146_s2] ss:$0 sm:$0xff] }
   0x6   :  { %50 = vmatpush.msra.mxu0 %v26_v3  ;;  %87 = vmatpush.msra.mxu1 %v26_v3 }
   0x8   :  { %51 = vmatpush.msra.mxu0 %v25_v4  ;;  %88 = vmatpush.msra.mxu1 %v25_v4  ;;  %v21_v7 = vld [vmem:[#allocation2] sm:$0xff] }
   0x9   :  { %83 = vmatmul.msk.f32.vlgmr.msra.gmra.mxu0 %vm29_vm1, %v23_v5  ;;  %84 = vmatmul.msk.f32.vlgmr.msra.gmra.mxu1 %vm29_vm1, %v24_v6  ;;  %v22_v8 = vld [vmem:[#allocation2 + $0x8] sm:$0xff] }
  0x86   :  { %v53_v9 = vpop.f32.mrf.mxu0  ;;  %v56_v10 = vpop.f32.mrf.mxu1 }
  0x87   :  { %v59_v11 = vadd.f32 %v53_v9, %v21_v7  ;;  %v60_v12 = vadd.f32 %v56_v10, %v22_v8 }
  0x89   :  { %62 = vst.msk [vmem:[#allocation2] sm:$0xff] %vm18_vm0, %v59_v11 }
  0x8a   :  { %63 = vst.msk [vmem:[#allocation2 + $0x8] sm:$0xff] %vm18_vm0, %v60_v12 }
  0x90   :  { %v67_v14 = vld [vmem:[#allocation2] sm:$0xff] }
  0x91   :  { %v73_v15 = vadd.f32 %v90_v13, %v67_v14  ;;  %v68_v16 = vld [vmem:[#allocation2 + $0x8] sm:$0xff] }
  0x92   :  { %v74_v17 = vadd.f32 %v90_v13, %v68_v16 }
  0x93   :  { %v75_v18 = vmax.f32 %v73_v15, 0.0 }
  0x94   :  { %v76_v19 = vmax.f32 %v74_v17, 0.0 }
  0x95   :  { %77 = vst.msk [vmem:[%s148_s3] sm:$0xff] %vm18_vm0, %v75_v18 }
  0x96   :  { %78 = vst.msk [vmem:[%s148_s3 + $0x8] sm:$0xff] %vm18_vm0, %v76_v19 }

</bundles_post_ra>
